<compile_context>
chip_gen: v7x
topology: tpu7x:2x2x1
jax: 0.10.0
libtpu: 0.0.40
codegen_flags: <defaults>
</compile_context>

<pallas_src>
import jax
import jax.numpy as jnp
from jax.experimental import pallas as pl
from jax.experimental.pallas import tpu as pltpu


def _round_up(x, m):
    return (x + m - 1) // m * m


def _attention_kernel(enc_ref, hid_ref, we_ref, wh_ref, b_ref, v_ref, out_ref):
    # enc_ref: (S, BB, E2)  encoder outputs (seq-major, PyTorch layout)
    # hid_ref: (BB, D)      decoder hidden state block
    # we_ref:  (D, E2)      encoder part of the attn Linear weight (nn.Linear layout)
    # wh_ref:  (D, D)       hidden part of the attn Linear weight
    # b_ref:   (1, D)       attn Linear bias
    # v_ref:   (1, D)       the `v` parameter
    # out_ref: (BB, S)      softmax attention weights, lane-dense in src_len
    S, BB, E2 = enc_ref.shape
    D = we_ref.shape[0]

    # Row-pack all (S * BB) encoder rows into a single MXU matmul.  BB is a
    # multiple of 8, so this reshape is sublane-aligned (layout-preserving).
    enc_rows = enc_ref[...].reshape(S * BB, E2)
    proj = jax.lax.dot_general(
        enc_rows, we_ref[...],
        dimension_numbers=(((1,), (1,)), ((), ())),     # x @ W_enc^T
        preferred_element_type=jnp.float32)              # (S*BB, D)

    # Hidden projection + bias, done in-kernel (tiny MXU matmul, no extra
    # XLA dispatch in the wrapper).
    hb = jax.lax.dot_general(
        hid_ref[...], wh_ref[...],
        dimension_numbers=(((1,), (1,)), ((), ())),     # hidden @ W_hid^T
        preferred_element_type=jnp.float32) + b_ref[...]  # (BB, D)

    # energy = tanh(enc @ W_enc^T + hidden @ W_hid^T + b)
    energy = jnp.tanh(proj.reshape(S, BB, D) + hb[None, :, :])       # (S, BB, D)

    # attention scores: v . energy  -> VPU multiply + lane reduction (XLU).
    scores = jnp.sum(energy * v_ref[...][None, :, :], axis=-1)       # (S, BB)

    # Lane-dense (BB, S) layout for the softmax + store.
    scores_bs = jnp.transpose(scores)                                 # (BB, S)

    # Softmax over src_len.
    m = jnp.max(scores_bs, axis=-1, keepdims=True)
    ex = jnp.exp(scores_bs - m)
    denom = jnp.sum(ex, axis=-1, keepdims=True)
    inv = pl.reciprocal(denom, approx=True)        # EUP slot (co-issues with VPU)
    inv = inv * (2.0 - denom * inv)                # one Newton step -> f32 accuracy
    out_ref[...] = (ex * inv).astype(out_ref.dtype)


def attention_forward(hidden, encoder_outputs, w_attn, b_attn, v, *,
                      block_batch=None):
    """Pallas implementation of the PyTorch Attention.forward.

    hidden:          (batch, dec_hid_dim)
    encoder_outputs: (src_len, batch, enc_hid_dim * 2)   (PyTorch convention)
    w_attn:          (dec_hid_dim, enc_hid_dim*2 + dec_hid_dim)
    b_attn:          (dec_hid_dim,)
    v:               (dec_hid_dim,)
    returns:         (batch, src_len) softmax attention weights
    """
    src_len, batch, enc2 = encoder_outputs.shape
    dec_hid = hidden.shape[1]

    # Split the concat-Linear weight; cat order in the reference is (hidden, enc).
    # No transpose / matmul in the wrapper -- everything heavy runs in-kernel.
    w_hid = w_attn[:, :dec_hid]                       # (D, D)
    w_enc = w_attn[:, dec_hid:]                       # (D, E2)
    b2 = b_attn[None, :]                              # (1, D)
    v2 = v[None, :]                                   # (1, D)

    if block_batch is None:
        # VMEM-aware batch block: biggest 8-aligned block whose double-buffered
        # encoder tile (plus f32 intermediates of similar size) stays well inside
        # the smallest scoped-VMEM default (v5e: 16 MiB).
        bytes_per_row = src_len * enc2 * 4             # one batch row of the enc block
        budget = 2 * 1024 * 1024                       # per enc buffer (x2 for pipelining)
        bb_cap = max(8, min(1024, (budget // max(bytes_per_row, 1)) // 8 * 8))
        bb = min(_round_up(batch, 8), bb_cap)
        # v7x megacore: with a large batch keep >= 2 fat "parallel" grid steps.
        if batch >= 128:
            bb = min(bb, _round_up(pl.cdiv(batch, 2), 8))
    else:
        bb = _round_up(block_batch, 8)
    nb = pl.cdiv(batch, bb)

    out = pl.pallas_call(
        _attention_kernel,
        out_shape=jax.ShapeDtypeStruct((batch, src_len), jnp.float32),
        grid=(nb,),
        in_specs=[
            pl.BlockSpec((src_len, bb, enc2), lambda i: (0, i, 0)),  # blocked over batch
            pl.BlockSpec((bb, dec_hid), lambda i: (i, 0)),
            pl.BlockSpec((dec_hid, enc2), lambda i: (0, 0)),         # grid-invariant weights
            pl.BlockSpec((dec_hid, dec_hid), lambda i: (0, 0)),
            pl.BlockSpec((1, dec_hid), lambda i: (0, 0)),
            pl.BlockSpec((1, dec_hid), lambda i: (0, 0)),
        ],
        out_specs=pl.BlockSpec((bb, src_len), lambda i: (i, 0)),     # lane-dense (BB, S)
        compiler_params=pltpu.CompilerParams(
            dimension_semantics=("parallel",)),
    )(encoder_outputs, hidden, w_enc, w_hid, b2, v2)
    return out


def attention_reference(hidden, encoder_outputs, w_attn, b_attn, v):
    """Plain-JAX mirror of the PyTorch forward, for correctness checking."""
    src_len, batch, _ = encoder_outputs.shape
    h_rep = jnp.repeat(hidden[:, None, :], src_len, axis=1)   # (B, S, D)
    enc = jnp.transpose(encoder_outputs, (1, 0, 2))           # (B, S, E2)
    cat = jnp.concatenate((h_rep, enc), axis=2)               # (B, S, D+E2)
    energy = jnp.tanh(cat @ w_attn.T + b_attn)                # (B, S, D)
    attention = jnp.einsum('d,bsd->bs', v, energy)            # (B, S)
    return jax.nn.softmax(attention, axis=1)


def _make_inputs(key, batch, src_len, enc_hid, dec_hid):
    k_h, k_e, k_w, k_b, k_v = jax.random.split(key, 5)
    hidden = jax.random.normal(k_h, (batch, dec_hid), dtype=jnp.float32)
    encoder_outputs = jax.random.normal(
        k_e, (src_len, batch, 2 * enc_hid), dtype=jnp.float32)
    in_feat = 2 * enc_hid + dec_hid
    bound = 1.0 / jnp.sqrt(jnp.float32(in_feat))
    w_attn = jax.random.uniform(k_w, (dec_hid, in_feat),
                                minval=-bound, maxval=bound, dtype=jnp.float32)
    b_attn = jax.random.uniform(k_b, (dec_hid,),
                                minval=-bound, maxval=bound, dtype=jnp.float32)
    v = jax.random.uniform(k_v, (dec_hid,), dtype=jnp.float32)
    return hidden, encoder_outputs, w_attn, b_attn, v


if __name__ == "__main__":
    ENC_HID = 16     # enc_hid_dim  -> encoder feature dim = 2*16 = 32
    DEC_HID = 32     # dec_hid_dim
    BATCH = 2
    SRC_LEN = 8

    key = jax.random.PRNGKey(0)

    # --- main demo shapes ---------------------------------------------------
    hidden, encoder_outputs, w_attn, b_attn, v = _make_inputs(
        key, BATCH, SRC_LEN, ENC_HID, DEC_HID)

    out = attention_forward(hidden, encoder_outputs, w_attn, b_attn, v)
    jax.block_until_ready(out)

    ref = attention_reference(hidden, encoder_outputs, w_attn, b_attn, v)
    assert out.shape == (BATCH, SRC_LEN)
    assert jnp.allclose(out, ref, atol=1e-4, rtol=1e-4), "mismatch vs reference"
    assert jnp.allclose(jnp.sum(out, axis=1), 1.0, atol=1e-4)

    # --- padded / multi-block path (batch not a multiple of the block) ------
    hidden2, enc2_out, w2, b2, v2 = _make_inputs(
        jax.random.PRNGKey(0), 10, 12, ENC_HID, DEC_HID)
    out2 = attention_forward(hidden2, enc2_out, w2, b2, v2, block_batch=8)
    jax.block_until_ready(out2)
    ref2 = attention_reference(hidden2, enc2_out, w2, b2, v2)
    assert jnp.allclose(out2, ref2, atol=1e-4, rtol=1e-4), "mismatch (padded blocks)"
    assert jnp.allclose(jnp.sum(out2, axis=1), 1.0, atol=1e-4)

    print("KERNEL_OK")
</pallas_src>

<mosaic_0001>
module attributes {stable_mosaic.version = 11 : i64} {
  func.func @_attention_kernel(%arg0: i32, %arg1: memref<8x8x32xf32, #tpu.memory_space<vmem>>, %arg2: memref<8x32xf32, #tpu.memory_space<vmem>>, %arg3: memref<32x32xf32, #tpu.memory_space<vmem>>, %arg4: memref<32x32xf32, #tpu.memory_space<vmem>>, %arg5: memref<1x32xf32, #tpu.memory_space<vmem>>, %arg6: memref<1x32xf32, #tpu.memory_space<vmem>>, %arg7: memref<8x8xf32, #tpu.memory_space<vmem>>) attributes {dimension_semantics = [#tpu.dimension_semantics<parallel>], iteration_bounds = array<i64: 1>, scalar_prefetch = 0 : i64, scratch_operands = 0 : i64, tpu.core_type = #tpu.core_type<tc>, window_params = [{transform_indices = @transform_0, window_bounds = array<i64: 8, 8, 32>}, {transform_indices = @transform_1, window_bounds = array<i64: 8, 32>}, {pipeline_mode = #tpu.pipeline_mode<synchronous>, transform_indices = @transform_2, window_bounds = array<i64: 32, 32>}, {pipeline_mode = #tpu.pipeline_mode<synchronous>, transform_indices = @transform_3, window_bounds = array<i64: 32, 32>}, {pipeline_mode = #tpu.pipeline_mode<synchronous>, transform_indices = @transform_4, window_bounds = array<i64: 1, 32>}, {pipeline_mode = #tpu.pipeline_mode<synchronous>, transform_indices = @transform_5, window_bounds = array<i64: 1, 32>}, {transform_indices = @transform_6, window_bounds = array<i64: 8, 8>}]} {
    %c0 = arith.constant 0 : index
    %c0_0 = arith.constant 0 : index
    %c0_1 = arith.constant 0 : index
    %0 = vector.load %arg1[%c0, %c0_0, %c0_1] : memref<8x8x32xf32, #tpu.memory_space<vmem>>, vector<8x8x32xf32>
    %1 = vector.shape_cast %0 : vector<8x8x32xf32> to vector<64x32xf32>
    %c0_2 = arith.constant 0 : index
    %c0_3 = arith.constant 0 : index
    %2 = vector.load %arg3[%c0_2, %c0_3] : memref<32x32xf32, #tpu.memory_space<vmem>>, vector<32x32xf32>
    %cst = arith.constant dense<0.000000e+00> : vector<64x32xf32>
    %3 = tpu.matmul %1, %2, %cst {dimension_numbers = #tpu.dot_dimension_numbers<[1], [1], [0], [0], [0, 0, 1, 0], [], []>} : vector<64x32xf32>, vector<32x32xf32>, vector<64x32xf32> -> vector<64x32xf32>
    %c0_4 = arith.constant 0 : index
    %c0_5 = arith.constant 0 : index
    %4 = vector.load %arg2[%c0_4, %c0_5] : memref<8x32xf32, #tpu.memory_space<vmem>>, vector<8x32xf32>
    %c0_6 = arith.constant 0 : index
    %c0_7 = arith.constant 0 : index
    %5 = vector.load %arg4[%c0_6, %c0_7] : memref<32x32xf32, #tpu.memory_space<vmem>>, vector<32x32xf32>
    %cst_8 = arith.constant dense<0.000000e+00> : vector<8x32xf32>
    %6 = tpu.matmul %4, %5, %cst_8 {dimension_numbers = #tpu.dot_dimension_numbers<[1], [1], [0], [0], [0, 0, 1, 0], [], []>} : vector<8x32xf32>, vector<32x32xf32>, vector<8x32xf32> -> vector<8x32xf32>
    %c0_9 = arith.constant 0 : index
    %c0_10 = arith.constant 0 : index
    %7 = vector.load %arg5[%c0_9, %c0_10] : memref<1x32xf32, #tpu.memory_space<vmem>>, vector<1x32xf32>
    %8 = vector.broadcast %7 : vector<1x32xf32> to vector<8x32xf32>
    %9 = arith.addf %6, %8 : vector<8x32xf32>
    %10 = vector.shape_cast %3 : vector<64x32xf32> to vector<8x8x32xf32>
    %11 = vector.shape_cast %9 : vector<8x32xf32> to vector<1x8x32xf32>
    %12 = vector.broadcast %11 : vector<1x8x32xf32> to vector<8x8x32xf32>
    %13 = arith.addf %10, %12 : vector<8x8x32xf32>
    %14 = math.tanh %13 : vector<8x8x32xf32>
    %c0_11 = arith.constant 0 : index
    %c0_12 = arith.constant 0 : index
    %15 = vector.load %arg6[%c0_11, %c0_12] : memref<1x32xf32, #tpu.memory_space<vmem>>, vector<1x32xf32>
    %16 = vector.shape_cast %15 : vector<1x32xf32> to vector<1x1x32xf32>
    %17 = vector.broadcast %16 : vector<1x1x32xf32> to vector<8x8x32xf32>
    %18 = arith.mulf %14, %17 : vector<8x8x32xf32>
    %cst_13 = arith.constant dense<0.000000e+00> : vector<8x8xf32>
    %19 = vector.multi_reduction <add>, %18, %cst_13 [2] : vector<8x8x32xf32> to vector<8x8xf32>
    %20 = tpu.transpose %19, [1, 0] : vector<8x8xf32> -> vector<8x8xf32>
    %cst_14 = arith.constant dense<0xFF800000> : vector<8xf32>
    %21 = vector.multi_reduction <maximumf>, %20, %cst_14 [1] : vector<8x8xf32> to vector<8xf32>
    %22 = vector.shape_cast %21 : vector<8xf32> to vector<8x1xf32>
    %23 = vector.broadcast %22 : vector<8x1xf32> to vector<8x8xf32>
    %24 = arith.subf %20, %23 : vector<8x8xf32>
    %25 = math.exp %24 : vector<8x8xf32>
    %cst_15 = arith.constant dense<0.000000e+00> : vector<8xf32>
    %26 = vector.multi_reduction <add>, %25, %cst_15 [1] : vector<8x8xf32> to vector<8xf32>
    %27 = vector.shape_cast %26 : vector<8xf32> to vector<8x1xf32>
    %28 = tpu.reciprocal %27 {approx = true} : vector<8x1xf32> -> vector<8x1xf32>
    %29 = arith.mulf %27, %28 : vector<8x1xf32>
    %cst_16 = arith.constant 2.000000e+00 : f32
    %30 = vector.broadcast %cst_16 : f32 to vector<8x1xf32>
    %31 = arith.subf %30, %29 : vector<8x1xf32>
    %32 = arith.mulf %28, %31 : vector<8x1xf32>
    %33 = vector.broadcast %32 : vector<8x1xf32> to vector<8x8xf32>
    %34 = arith.mulf %25, %33 : vector<8x8xf32>
    %c0_17 = arith.constant 0 : index
    %c0_18 = arith.constant 0 : index
    %35 = vector.load %arg7[%c0_17, %c0_18] : memref<8x8xf32, #tpu.memory_space<vmem>>, vector<8x8xf32>
    tpu.vector_store %arg7[%c0_17, %c0_18], %34 {strides = array<i32>} : memref<8x8xf32, #tpu.memory_space<vmem>>, vector<8x8xf32>,
    return
  }
  func.func @transform_0(%arg0: i32) -> (i32, i32, i32) {
    %c0_i32 = arith.constant 0 : i32
    %c0_i32_0 = arith.constant 0 : i32
    %c0_i32_1 = arith.constant 0 : i32
    return %c0_i32, %arg0, %c0_i32_0 : i32, i32, i32
  }
  func.func @transform_1(%arg0: i32) -> (i32, i32) {
    %c0_i32 = arith.constant 0 : i32
    %c0_i32_0 = arith.constant 0 : i32
    return %arg0, %c0_i32 : i32, i32
  }
  func.func @transform_2(%arg0: i32) -> (i32, i32) {
    %c0_i32 = arith.constant 0 : i32
    %c0_i32_0 = arith.constant 0 : i32
    %c0_i32_1 = arith.constant 0 : i32
    return %c0_i32, %c0_i32_0 : i32, i32
  }
  func.func @transform_3(%arg0: i32) -> (i32, i32) {
    %c0_i32 = arith.constant 0 : i32
    %c0_i32_0 = arith.constant 0 : i32
    %c0_i32_1 = arith.constant 0 : i32
    return %c0_i32, %c0_i32_0 : i32, i32
  }
  func.func @transform_4(%arg0: i32) -> (i32, i32) {
    %c0_i32 = arith.constant 0 : i32
    %c0_i32_0 = arith.constant 0 : i32
    %c0_i32_1 = arith.constant 0 : i32
    return %c0_i32, %c0_i32_0 : i32, i32
  }
  func.func @transform_5(%arg0: i32) -> (i32, i32) {
    %c0_i32 = arith.constant 0 : i32
    %c0_i32_0 = arith.constant 0 : i32
    %c0_i32_1 = arith.constant 0 : i32
    return %c0_i32, %c0_i32_0 : i32, i32
  }
  func.func @transform_6(%arg0: i32) -> (i32, i32) {
    %c0_i32 = arith.constant 0 : i32
    %c0_i32_0 = arith.constant 0 : i32
    return %arg0, %c0_i32 : i32, i32
  }
}

</mosaic_0001>

<bundles_post_ra>
// kernel: tpu_custom_call.1
= control target key start
LH: loop header
LB: loop body
LE: loop exit
PB: predicated region body
PF: predicated region fallthrough
CT: control target
= control target key end

     0   :  { %11 = vsyncpa [#allocation3], 0  ;;  %s855_s0 = inlined_call_operand.hbm [shape: f32[8,2,32], index: 0, kind: input, shape index: {}]   ;;  %s856_s1 = inlined_call_operand.vmem [shape: f32[2,32], index: 1, kind: input, shape index: {}]   ;;  %s857_s2 = inlined_call_operand.hbm [shape: f32[32,32], index: 2, kind: input, shape index: {}]   ;;  %s858_s3 = inlined_call_operand.hbm [shape: f32[32,32], index: 3, kind: input, shape index: {}]   ;;  %s859_s4 = inlined_call_operand.vmem [shape: f32[1,32], index: 4, kind: input, shape index: {}]   ;;  %s860_s5 = inlined_call_operand.vmem [shape: f32[1,32], index: 5, kind: input, shape index: {}]   ;;  %s861_s6 = inlined_call_operand.hbm [shape: f32[2,8], index: 6, kind: output, shape index: {}]  }
   0x1   :  { %12 = vsyncpa [#allocation6], 0 }
   0x2   :  { %13 = vsyncpa [#allocation4], 0 }
   0x3   :  { %18 = vsyncadd [#allocation3], 768  ;;  %s23_s21 = sld [smem:[#allocation0]]   ;;  %s717_s22 = smov [#allocation2]  }
   0x4   :  { %s31_s23 = sshll.u32 %s717_s22, 4  ;;  %s718_s24 = smov 32   ;;  %s32_s23 = int_to_ptr.vmem [resolvable:$true] %s31_s23 }
   0x5   :  { %38 = sst [smem:[#allocation10]] %s718_s24  ;;  %s719_s25 = smov 128  }
   0x6   :  { %40 = sst [smem:[#allocation10 + $0x1]] %s719_s25  ;;  %s720_s26 = smov 1  }
   0x7   :  { %42 = sst [smem:[#allocation10 + $0x2]] %s720_s26  ;;  %s721_s29 = smov 2  }
   0x8   :  { %44 = sst [smem:[#allocation10 + $0x3]] %s718_s24  ;;  %s722_s30 = smov [#allocation3]  }
   0x9   :  { %s519_s27 = sshll.u32 %s23_s21, 26  ;;  %46 = sst [smem:[#allocation10 + $0x4]] %s718_s24 }
   0xa   :  { %s520_s28 = sadd.s32 134217728, %s519_s27  ;;  %48 = sst [smem:[#allocation10 + $0x5]] %s721_s29 }
   0xb   :  { %s723_s7 = smov [#allocation9]   ;;  %s724_s10 = smov [#allocation5]  }
   0xc   :  { %50 = dma.general %s855_s0, 256, %s32_s23, %s722_s30, %s723_s7, [#allocation10], %s520_s28, 0  }
   0xd   :  { %s58_s11 = sshll.u32 %s724_s10, 4  ;;  %s645_s14 = scalar_lea.hbm %s857_s2, 512  ;;  %s59_s11 = int_to_ptr.vmem [resolvable:$true] %s58_s11 }
   0xe   :  { %p646_p0 = scmp.ne.s32.totalorder %s857_s2, %s645_s14  ;;  %p649_p1 = scmp.lt.u32.totalorder %s645_s14, %s857_s2 }
  0x10   :  { %p651_p2 = pnand %p649_p1, %p646_p0 }
  0x12   :  { %654 = shalt.err (!%p651_p2)
}
  0x13   :  { %s655_s19 = scalar_lea.vmem %s59_s11, 512  ;;  %p660_p4 = scmp.lt.s32.totalorder %s59_s11, %s59_s11 }
  0x14   :  { %p656_p3 = scmp.ne.s32.totalorder %s59_s11, %s655_s19  ;;  %p661_p5 = scmp.lt.s32.totalorder %s655_s19, %s655_s19 }
  0x16   :  { %p662_p6 = por %p661_p5, %p660_p4 }
  0x18   :  { %p663_p7 = pnand %p662_p6, %p656_p3 }
  0x1a   :  { %666 = shalt.err (!%p663_p7)
}
  0x1b   :  { %s725_s0 = smov 128   ;;  %s726_s20 = smov 8  }
  0x1c   :  { %64 = dma.hbm_to_vmem [thread:$0]  %s857_s2, 512, %s59_s11, [#allocation6], %s725_s0, %s725_s0, %s726_s20  }
  0x1d   :  { %s727_s23 = smov [#allocation7]   ;;  %s667_s27 = scalar_lea.hbm %s858_s3, 512 }
  0x1e   :  { %s70_s24 = sshll.u32 %s727_s23, 4  ;;  %p668_p8 = scmp.ne.s32.totalorder %s858_s3, %s667_s27  ;;  %s71_s24 = int_to_ptr.vmem [resolvable:$true] %s70_s24 }
  0x1f   :  { %p671_p9 = scmp.lt.u32.totalorder %s667_s27, %s858_s3 }
  0x21   :  { %p673_p10 = pnand %p671_p9, %p668_p8 }
  0x23   :  { %676 = shalt.err (!%p673_p10)
}
  0x24   :  { %s677_s8 = scalar_lea.vmem %s71_s24, 512  ;;  %p682_p12 = scmp.lt.s32.totalorder %s71_s24, %s71_s24 }
  0x25   :  { %p678_p11 = scmp.ne.s32.totalorder %s71_s24, %s677_s8  ;;  %p683_p13 = scmp.lt.s32.totalorder %s677_s8, %s677_s8 }
  0x27   :  { %p684_p0 = por %p683_p13, %p682_p12 }
  0x29   :  { %p685_p1 = pnand %p684_p0, %p678_p11 }
  0x2b   :  { %688 = shalt.err (!%p685_p1)
}
  0x2c   :  { %76 = dma.hbm_to_vmem [thread:$0]  %s858_s3, 512, %s71_s24, [#allocation6], %s725_s0, %s725_s0, %s726_s20  }
  0x2d   :  { %711 = dma.done.wait [#allocation3], 1024  }
  0x2e   :  { %712 = vsyncadd [#allocation3], 4294966272 }
  0x2f   :  { %713 = dma.done.wait [#allocation6], 1024  }
  0x30   :  { %714 = vsyncadd [#allocation6], 4294966272  ;;  %v728_v0 = vmov 0.0|0.0   ;;  %vm729_vm0 = vmmov 0   ;;  %v730_v1 = vmov 0.0   ;;  %vm102_vm1 = vcmask 261120  }
  0x31   :  { %600 = vmatprep.subr.bf16.mxu1 %v728_v0  ;;  %585 = vmatprep.mubr.msk.f32.mxu1 %vm729_vm0, %v730_v1  ;;  %vm798_vm2 = vmpackc.low %vm102_vm1, %vm102_vm1  ;;  %v98_v3 = vld [vmem:[#allocation5] sm:$0xff]  ;;  %v99_v4 = vld [vmem:[#allocation5 + $0x8] sm:$0xff]  ;;  %vm438_vm3 = vcmask 1041409   ;;  %vm440_vm4 = vcmask 1042434   ;;  %vm442_vm5 = vcmask 1043459   ;;  %vm444_vm6 = vcmask 1044484  }
  0x32   :  { %v245_v5 = vld [vmem:[#allocation7] sm:$0xff]  ;;  %v588_v6 = vpack.c.bf16 %v99_v4, %v98_v3  ;;  %v246_v7 = vld [vmem:[#allocation7 + $0x8] sm:$0xff]  ;;  %v100_v8 = vld [vmem:[#allocation5 + $0x10] sm:$0xff]  ;;  %vm446_vm7 = vcmask 1045509   ;;  %vm448_vm8 = vcmask 1046534   ;;  %vm450_vm9 = vcmask 1047559  }
  0x33   :  { %v101_v9 = vld [vmem:[#allocation5 + $0x18] sm:$0xff]  ;;  %v601_v10 = vpack.c.bf16 %v246_v7, %v245_v5  ;;  %v90_v12 = vld [vmem:[#allocation2] sm:$0xff]  ;;  %v247_v13 = vld [vmem:[#allocation7 + $0x10] sm:$0xff]  ;;  %v404_v5 = vlaneseq  ;;  %vm485_vm10 = vcmask 64512  }
  0x34   :  { %v594_v11 = vpack.c.bf16 %v101_v9, %v100_v8  ;;  %590 = vmatprep.subr.msk.bf16.mxu0 %vm798_vm2, %v588_v6  ;;  %565 = vmatprep.mubr.msk.f32.mxu0 %vm102_vm1, %v90_v12  ;;  %v248_v14 = vld [vmem:[#allocation7 + $0x18] sm:$0xff]  ;;  %v244_v16 = vld [vmem:[%s856_s1] sm:$0xff]  ;;  %v91_v17 = vld [vmem:[#allocation2 + $0x8] sm:$0xff] }
  0x35   :  { %603 = vmatpush3.bf16.xpose.msk.msra.mxu1 %vm798_vm2, %v601_v10  ;;  %593 = vmatpush3.bf16.xpose.msk.msra.mxu0 %vm798_vm2, %v588_v6  ;;  %v605_v15 = vpack.c.bf16 %v248_v14, %v247_v13  ;;  %v92_v18 = vld [vmem:[#allocation2 + $0x10] sm:$0xff]  ;;  %v93_v19 = vld [vmem:[#allocation2 + $0x18] sm:$0xff]  ;;  %v94_v20 = vld [vmem:[#allocation2 + $0x20] sm:$0xff]  ;;  %v405_v6 = vand.u32 127, %v404_v5  ;;  %v407_v7 = vshrl.u32 %v404_v5, 7 }
  0x36   :  { %604 = vmatprep.subr.bf16.mxu1 %v728_v0  ;;  %596 = vmatprep.subr.msk.bf16.mxu0 %vm798_vm2, %v594_v11  ;;  %v95_v21 = vld [vmem:[#allocation2 + $0x28] sm:$0xff]  ;;  %v96_v22 = vld [vmem:[#allocation2 + $0x30] sm:$0xff]  ;;  %v97_v23 = vld [vmem:[#allocation2 + $0x38] sm:$0xff] }
  0x37   :  { %v533_v24 = vld [vmem:[%s859_s4] ss:$0 sm:$0xff]  ;;  %v408_v9 = vsub.s32 %v405_v6, %v407_v7 }
  0x38   :  { %v539_v44 = vld [vmem:[%s860_s5] ss:$0 sm:$0xff] }
  0x3d   :  { %607 = vmatpush3.bf16.xpose.msk.msra.mxu1 %vm798_vm2, %v605_v15  ;;  %599 = vmatpush3.bf16.xpose.msk.msra.mxu0 %vm798_vm2, %v594_v11 }
  0x44   :  { %586 = vmatmul.mubr.msk.f32.vlgmr.msra.gmra.mrb[0].mxu1 %vm102_vm1, %v244_v16  ;;  %566 = vmatmul.mubr.msk.f32.vlgmr.msra.gmra.mrb[0].mxu0 %vm102_vm1, %v91_v17 }
  0x45   :  { %568 = vmatprep.mubr.msk.f32.mxu0 %vm102_vm1, %v92_v18 }
  0x48   :  { %569 = vmatmul.mubr.msk.f32.gmra.mrb[2].mxu0 %vm102_vm1, %v93_v19 }
  0x49   :  { %571 = vmatprep.mubr.msk.f32.mxu0 %vm102_vm1, %v94_v20 }
  0x4c   :  { %572 = vmatmul.mubr.msk.f32.gmra.mrb[4].mxu0 %vm102_vm1, %v95_v21 }
  0x4d   :  { %574 = vmatprep.mubr.msk.f32.mxu0 %vm102_vm1, %v96_v22 }
  0x50   :  { %575 = vmatmul.mubr.msk.f32.gmra.mrb[6].mxu0 %vm102_vm1, %v97_v23 }
 0x117   :  { %v337_v25 = vpop.f32.mrb[0].mxu1  ;;  %v567_v26 = vpop.f32.mrb[0].mxu0 }
 0x118   :  { %v338_v27 = vadd.f32 %v533_v24, %v337_v25  ;;  %v205_v28 = vpop.f32.mrb[1].mxu0  ;;  %v587_v29 = vpop.f32.mrb[1].mxu1 }
 0x11a   :  { %v342_v30 = vadd.f32 %v567_v26, %v338_v27  ;;  %v341_v31 = vadd.f32 %v338_v27, %v205_v28 }
 0x11b   :  { %v570_v32 = vpop.f32.mrb[2].mxu0 }
 0x11c   :  { %625 = vtanh.f32 %v342_v30  ;;  %v344_v33 = vadd.f32 %v570_v32, %v338_v27  ;;  %v215_v34 = vpop.f32.mrb[3].mxu0 }
 0x11d   :  { %627 = vtanh.f32 %v341_v31  ;;  %v343_v35 = vadd.f32 %v338_v27, %v215_v34 }
 0x11e   :  { %629 = vtanh.f32 %v344_v33 }
 0x11f   :  { %631 = vtanh.f32 %v343_v35  ;;  %v573_v36 = vpop.f32.mrb[4].mxu0 }
 0x120   :  { %v346_v37 = vadd.f32 %v573_v36, %v338_v27  ;;  %v225_v38 = vpop.f32.mrb[5].mxu0 }
 0x121   :  { %v345_v39 = vadd.f32 %v338_v27, %v225_v38 }
 0x122   :  { %633 = vtanh.f32 %v346_v37 }
 0x123   :  { %635 = vtanh.f32 %v345_v39  ;;  %v576_v40 = vpop.f32.mrb[6].mxu0 }
 0x124   :  { %v348_v41 = vadd.f32 %v576_v40, %v338_v27  ;;  %v235_v42 = vpop.f32.mrb[7].mxu0 }
 0x125   :  { %v347_v43 = vadd.f32 %v338_v27, %v235_v42 }
 0x126   :  { %v626_v45 = vpop.eup %625  ;;  %637 = vtanh.f32 %v348_v41 }
 0x127   :  { %v628_v46 = vpop.eup %627  ;;  %639 = vtanh.f32 %v347_v43  ;;  %v365_v52 = vmul.f32 %v626_v45, %v539_v44 }
 0x128   :  { %v630_v47 = vpop.eup %629  ;;  %v364_v48 = vmul.f32 %v628_v46, %v539_v44 }
 0x129   :  { %v632_v49 = vpop.eup %631  ;;  %v367_v50 = vmul.f32 %v630_v47, %v539_v44  ;;  %v375_v57 = vsel %vm102_vm1, %v365_v52, 0.0 }
 0x12a   :  { %v372_v51 = vsel %vm102_vm1, %v364_v48, 0.0  ;;  %v366_v54 = vmul.f32 %v632_v49, %v539_v44 }
 0x12b   :  { %373 = vadd.xlane.f32.xlu0 %v372_v51  ;;  %v381_v53 = vsel %vm102_vm1, %v367_v50, 0.0 }
 0x12c   :  { %v634_v55 = vpop.eup %633  ;;  %382 = vadd.xlane.f32.xlu1 %v381_v53  ;;  %v378_v59 = vsel %vm102_vm1, %v366_v54, 0.0 }
 0x12d   :  { %v636_v56 = vpop.eup %635  ;;  %v369_v60 = vmul.f32 %v634_v55, %v539_v44 }
 0x12e   :  { %v368_v58 = vmul.f32 %v636_v56, %v539_v44 }
 0x12f   :  { %376 = vadd.xlane.f32.xlu0 %v375_v57  ;;  %v387_v1 = vsel %vm102_vm1, %v369_v60, 0.0 }
 0x130   :  { %v638_v61 = vpop.eup %637  ;;  %379 = vadd.xlane.f32.xlu1 %v378_v59  ;;  %v384_v62 = vsel %vm102_vm1, %v368_v58, 0.0 }
 0x131   :  { %v640_v63 = vpop.eup %639  ;;  %v371_v2 = vmul.f32 %v638_v61, %v539_v44 }
 0x132   :  { %v370_v0 = vmul.f32 %v640_v63, %v539_v44 }
 0x133   :  { %385 = vadd.xlane.f32.xlu0 %v384_v62  ;;  %v393_v4 = vsel %vm102_vm1, %v371_v2, 0.0 }
 0x134   :  { %388 = vadd.xlane.f32.xlu1 %v387_v1  ;;  %v390_v3 = vsel %vm102_vm1, %v370_v0, 0.0 }
 0x137   :  { %391 = vadd.xlane.f32.xlu0 %v390_v3 }
 0x138   :  { %394 = vadd.xlane.f32.xlu1 %v393_v4 }
 0x1b8   :  { %v374_v8 = vpop.xlane.xlu0 %373 }
 0x1b9   :  { %v383_v10 = vpop.xlane.xlu1 %382  ;;  %v409_v12 = vrot.slane %v374_v8, %v408_v9 }
 0x1ba   :  { %v421_v16 = vrot.slane %v383_v10, %v408_v9 }
 0x1bc   :  { %v377_v11 = vpop.xlane.xlu0 %376 }
 0x1bd   :  { %v413_v13 = vrot.slane %v377_v11, %v408_v9  ;;  %v380_v14 = vpop.xlane.xlu1 %379 }
 0x1be   :  { %v417_v15 = vrot.slane %v380_v14, %v408_v9 }
 0x1bf   :  { %v439_v17 = vsel %vm438_vm3, %v413_v13, %v409_v12 }
 0x1c0   :  { %v441_v18 = vsel %vm440_vm4, %v417_v15, %v439_v17  ;;  %v386_v19 = vpop.xlane.xlu0 %385 }
 0x1c1   :  { %v443_v20 = vsel %vm442_vm5, %v421_v16, %v441_v18  ;;  %v425_v21 = vrot.slane %v386_v19, %v408_v9  ;;  %v389_v22 = vpop.xlane.xlu1 %388 }
 0x1c2   :  { %v429_v23 = vrot.slane %v389_v22, %v408_v9 }
 0x1c3   :  { %v445_v24 = vsel %vm444_vm6, %v425_v21, %v443_v20 }
 0x1c4   :  { %v392_v25 = vpop.xlane.xlu0 %391  ;;  %v447_v26 = vsel %vm446_vm7, %v429_v23, %v445_v24 }
 0x1c5   :  { %v433_v27 = vrot.slane %v392_v25, %v408_v9  ;;  %v395_v28 = vpop.xlane.xlu1 %394 }
 0x1c6   :  { %v437_v29 = vrot.slane %v395_v28, %v408_v9 }
 0x1c7   :  { %v449_v30 = vsel %vm448_vm8, %v433_v27, %v447_v26 }
 0x1c8   :  { %v451_v31 = vsel %vm450_vm9, %v437_v29, %v449_v30 }
 0x1c9   :  { %453 = vxpose.xlu0.b32.start.end [1/1] (short) (narrow) %v451_v31, 8 }
 0x249   :  { %v469_v32 = vpop.trf.xlu0 }
 0x24a   :  { %v486_v33 = vsel %vm485_vm10, %v469_v32, -inf }
 0x24b   :  { %487 = vmax.xlane.f32.xlu1 %v486_v33 }
 0x2d8   :  { %v488_v34 = vpop.xlane.xlu1 %487 }
 0x2d9   :  { %v489_v35 = vsub.f32 %v469_v32, %v488_v34 }
 0x2db   :  { %v490_v36 = vmul.f32 1.442695, %v489_v35 }
 0x2dd   :  { %641 = vpow2.f32 %v490_v36 }
 0x2e7   :  { %v642_v37 = vpop.eup %641 }
 0x2e8   :  { %v492_v38 = vsel %vm485_vm10, %v642_v37, 0.0 }
 0x2e9   :  { %493 = vadd.xlane.f32.xlu1 %v492_v38 }
 0x376   :  { %v494_v39 = vpop.xlane.xlu1 %493 }
 0x377   :  { %643 = vrcp.f32 %v494_v39 }
 0x381   :  { %v644_v40 = vpop.eup %643 }
 0x382   :  { %v496_v41 = vmul.f32 %v644_v40, %v494_v39 }
 0x384   :  { %v497_v42 = vsub.f32 2.0, %v496_v41 }
 0x386   :  { %v498_v43 = vmul.f32 %v644_v40, %v497_v42 }
 0x388   :  { %v499_v44 = vmul.f32 %v642_v37, %v498_v43 }
 0x38a   :  { %500 = vst.msk [vmem:[#allocation8] sm:$0xff] %vm485_vm10, %v499_v44 }
 0x38b   :  { %505 = vsyncadd [#allocation4], 96  ;;  %s731_s5 = smov [#allocation8]  }
 0x38c   :  { %s506_s13 = sshll.u32 %s731_s5, 4  ;;  %s507_s13 = int_to_ptr.vmem [resolvable:$true] %s506_s13 }
 0x38d   :  { %s689_s14 = scalar_lea.vmem %s507_s13, 32  ;;  %s693_s15 = scalar_lea.vmem %s507_s13, 128 }
 0x38e   :  { %p690_p2 = scmp.ne.s32.totalorder %s507_s13, %s689_s14  ;;  %p694_p3 = scmp.lt.s32.totalorder %s507_s13, %s507_s13 }
 0x38f   :  { %p695_p4 = scmp.lt.s32.totalorder %s693_s15, %s689_s14 }
 0x391   :  { %p696_p5 = por %p695_p4, %p694_p3 }
 0x393   :  { %p697_p6 = pnand %p696_p5, %p690_p2 }
 0x395   :  { %700 = shalt.err (!%p697_p6)
}
 0x396   :  { %s701_s18 = scalar_lea.hbm %s861_s6, 32 }
 0x397   :  { %p702_p7 = scmp.ne.s32.totalorder %s861_s6, %s701_s18  ;;  %p705_p8 = scmp.lt.u32.totalorder %s701_s18, %s861_s6 }
 0x399   :  { %p707_p9 = pnand %p705_p8, %p702_p7 }
 0x39b   :  { %710 = shalt.err (!%p707_p9)
}
 0x39c   :  { %s732_s22 = smov 32   ;;  %s733_s23 = smov 2  }
 0x39d   :  { %512 = dma.vmem_to_hbm [thread:$0]  %s507_s13, 32, %s861_s6, [#allocation4], %s732_s22, %s732_s22, %s733_s23  }
 0x39e   :  { %715 = dma.done.wait [#allocation4], 128  }
 0x39f   :  { %716 = vsyncadd [#allocation4], 4294967168 }
 0x3a0   :  { %516 = vsyncpa [#allocation3], 1 }
 0x3a1   :  { %517 = vsyncpa [#allocation6], 1 }
 0x3a2   :  { %518 = vsyncpa [#allocation4], 1 }

</bundles_post_ra>
